<compile_context>
chip_gen: v7x
topology: tpu7x:2x2x1
jax: 0.10.0
libtpu: 0.0.40
codegen_flags: <defaults>
</compile_context>

<pallas_src>
import functools
import math

import numpy as np
import jax
import jax.numpy as jnp
from jax.experimental import pallas as pl
from jax.experimental.pallas import tpu as pltpu

SIZES = (1, 3, 6, 8)
_LANE = 128
_TILE_M_CAP = 1024      # measured sweep: 512 -> 85%, 1024 -> 86% of HBM roofline
_TILE_M_TARGET = 512    # keep the MXU M-dim fat before resorting to K-tiling


def _round_up(x: int, m: int) -> int:
    return ((x + m - 1) // m) * m


# ----------------------------------------------------------------------------
# Pooling "weights": 0/1 bin-membership matrix + per-bin 1/count scale.
# Factoring M = B @ diag(1/count) keeps B exact in both f32 and bf16 and moves
# the rounding-sensitive 1/count into a cheap f32 post-scale on the output.
# ----------------------------------------------------------------------------
def _adaptive_pool_1d_indicator(in_size: int, out_size: int) -> np.ndarray:
    p = np.zeros((out_size, in_size), dtype=np.float32)
    for i in range(out_size):
        start = (i * in_size) // out_size
        end = math.ceil((i + 1) * in_size / out_size)
        p[i, start:end] = 1.0
    return p


def build_psp_indicator(h: int, w: int, sizes=SIZES):
    """B: (H*W, L) 0/1 membership; scale: (L,) = 1/bin_count (f32)."""
    cols, inv_counts = [], []
    for s in sizes:
        ih = _adaptive_pool_1d_indicator(h, s)      # (s, H)
        iw = _adaptive_pool_1d_indicator(w, s)      # (s, W)
        m2d = np.kron(ih, iw)                       # (s*s, H*W), entries 0/1
        cols.append(m2d.T)                          # (H*W, s*s)
        inv_counts.append(1.0 / m2d.sum(axis=1))    # (s*s,)
    b = np.concatenate(cols, axis=1).astype(np.float32)
    scale = np.concatenate(inv_counts).astype(np.float32)
    return b, scale


# ----------------------------------------------------------------------------
# Kernel: one (row-tile, K-tile) step of acc += X_tile @ B_tile; at the last K
# step apply the f32 1/count post-scale and store the lane-dense output tile.
# ----------------------------------------------------------------------------
def _psp_matmul_kernel(x_ref, b_ref, scale_ref, o_ref, acc_ref, *,
                       compute_dtype, precision):
    k = pl.program_id(1)

    @pl.when(k == 0)
    def _():
        acc_ref[...] = jnp.zeros_like(acc_ref)

    # In-kernel cast (no extra wrapper-side HBM pass); no-op on the f32 path.
    x = x_ref[...].astype(compute_dtype)
    acc_ref[...] += jnp.dot(
        x, b_ref[...], precision=precision, preferred_element_type=jnp.float32
    )

    @pl.when(k == pl.num_programs(1) - 1)
    def _():
        # Per-column 1/bin_count in f32 on the VPU (free next to the dot).
        o_ref[...] = (acc_ref[...] * scale_ref[...]).astype(o_ref.dtype)


# ----------------------------------------------------------------------------
# Tiling / VMEM policy.
# ----------------------------------------------------------------------------
def _vmem_budget():
    """Generation-aware (budget, limit): 128 MiB parts -> ~96/112 MiB,
    v7x's 64 MiB per-core VMEM -> ~48/56 MiB."""
    try:
        cap = int(pltpu.get_tpu_info().vmem_capacity_bytes)
    except Exception:
        cap = 64 * 1024 * 1024      # conservative fallback (v7x per-core VMEM)
    return (cap * 3) // 4, (cap * 7) // 8


def _pick_tiles(rows, hw, l_pad, x_itemsize, b_itemsize, budget):
    """Pick (tile_m, tile_k): tile_k divides hw exactly, tile_m multiple of 8."""
    rows8 = _round_up(rows, 8)

    def max_tile_m(tile_k):
        # Double-buffered X/out, double-buffered B, scale row, f32 accumulator.
        fixed = 2 * tile_k * l_pad * b_itemsize + 2 * l_pad * 4
        per_row = 2 * tile_k * x_itemsize + 3 * l_pad * 4
        tm = (budget - fixed) // per_row
        tm = min(tm, _TILE_M_CAP, rows8)
        return max(0, (tm // 8) * 8)

    # Prefer no K split (B stays VMEM-resident).  Split K only if the row tile
    # would otherwise collapse; only exact, lane-aligned divisors of hw are
    # legal (a ragged K block would feed garbage into the accumulator).
    tile_k = hw
    tile_m = max_tile_m(hw)
    if tile_m < min(_TILE_M_TARGET, rows8):
        for splits in range(2, 129):
            if hw % splits:
                continue
            tk = hw // splits
            if tk % _LANE:
                continue
            tm = max_tile_m(tk)
            if tm > tile_m:
                tile_m, tile_k = tm, tk
            if tm >= min(_TILE_M_TARGET, rows8):
                break
    tile_m = max(8, tile_m)

    # Guarantee >= 2 row tiles when there is enough work so the "parallel" row
    # axis can be sharded over v7x's two TensorCores (harmless on v5e/v6e).
    if rows > 8 and tile_m >= rows:
        tile_m = max(8, _round_up((rows + 1) // 2, 8))

    # Prefer a tile_m that divides rows (no ragged last block), but never
    # shrink the tile by more than 2x just to avoid the ragged tail.
    if rows % tile_m:
        for t in range(tile_m, max(8, tile_m // 2) - 1, -8):
            if rows % t == 0:
                tile_m = t
                break
    return tile_m, tile_k


# ----------------------------------------------------------------------------
# Public wrapper.
# ----------------------------------------------------------------------------
def psp_module(feats: jax.Array, sizes=SIZES, use_bf16: bool = False) -> jax.Array:
    """feats: (N, C, H, W) -> (N, C, sum(s*s)); matches PyTorch PSPModule."""
    n, c, h, w = feats.shape
    hw = h * w
    l_total = sum(s * s for s in sizes)
    l_pad = _round_up(max(l_total, _LANE), _LANE)     # lane-dense output tile

    b_np, scale_np = build_psp_indicator(h, w, sizes)
    if l_pad > l_total:
        b_np = np.pad(b_np, ((0, 0), (0, l_pad - l_total)))
        scale_np = np.pad(scale_np, (0, l_pad - l_total), constant_values=1.0)

    compute_dtype = jnp.bfloat16 if use_bf16 else jnp.float32
    precision = (jax.lax.Precision.DEFAULT if use_bf16
                 else jax.lax.Precision.HIGHEST)

    b = jnp.asarray(b_np, dtype=compute_dtype)        # 0/1: exact in bf16 too
    scale = jnp.asarray(scale_np).reshape(1, l_pad)   # f32 post-scale row

    # No wrapper-side pad or cast of X: either would add a full extra HBM pass
    # in front of a kernel that is essentially one HBM read of X.
    x_flat = feats.reshape(n * c, hw)
    rows = n * c

    budget, vmem_limit = _vmem_budget()
    tile_m, tile_k = _pick_tiles(rows, hw, l_pad,
                                 x_flat.dtype.itemsize, b.dtype.itemsize,
                                 budget)
    grid = (pl.cdiv(rows, tile_m), hw // tile_k)

    kernel = functools.partial(_psp_matmul_kernel,
                               compute_dtype=compute_dtype,
                               precision=precision)

    cost = pl.CostEstimate(
        flops=2 * rows * hw * l_pad,
        transcendentals=0,
        bytes_accessed=(x_flat.size * x_flat.dtype.itemsize
                        + b.size * b.dtype.itemsize
                        + rows * l_pad * 4),
    )

    y = pl.pallas_call(
        kernel,
        out_shape=jax.ShapeDtypeStruct((rows, l_pad), jnp.float32),
        grid=grid,
        in_specs=[
            # X: (row, K) tile per step, double-buffered pipeline; the ragged
            # last row block (if any) only feeds output rows Pallas masks off.
            pl.BlockSpec((tile_m, tile_k), lambda i, k: (i, k)),
            # B: index depends only on k; VMEM-resident when tile_k == hw.
            pl.BlockSpec((tile_k, l_pad), lambda i, k: (k, 0)),
            # 1/bin_count row: constant -> resident.
            pl.BlockSpec((1, l_pad), lambda i, k: (0, 0)),
        ],
        out_specs=pl.BlockSpec((tile_m, l_pad), lambda i, k: (i, 0)),
        scratch_shapes=[pltpu.VMEM((tile_m, l_pad), jnp.float32)],
        compiler_params=pltpu.CompilerParams(
            dimension_semantics=("parallel", "arbitrary"),
            vmem_limit_bytes=vmem_limit,
        ),
        cost_estimate=cost,
    )(x_flat, b, scale)

    # Drop the 18 zero-pad lanes (rows are already exact: no wrapper pad).
    return y[:, :l_total].reshape(n, c, l_total).astype(feats.dtype)


# ----------------------------------------------------------------------------
# Pure-numpy reference (direct bin averaging) for the correctness check.
# ----------------------------------------------------------------------------
def _reference_psp(feats_np: np.ndarray, sizes=SIZES) -> np.ndarray:
    n, c, h, w = feats_np.shape
    outs = []
    for s in sizes:
        pooled = np.zeros((n, c, s, s), dtype=np.float32)
        for i in range(s):
            hs = (i * h) // s
            he = math.ceil((i + 1) * h / s)
            for j in range(s):
                ws = (j * w) // s
                we = math.ceil((j + 1) * w / s)
                pooled[:, :, i, j] = feats_np[:, :, hs:he, ws:we].mean(axis=(2, 3))
        outs.append(pooled.reshape(n, c, s * s))
    return np.concatenate(outs, axis=-1)


if __name__ == "__main__":
    key = jax.random.PRNGKey(0)
    N, C, H, W = 2, 4, 16, 16
    feats = jax.random.normal(key, (N, C, H, W), dtype=jnp.float32)

    out = psp_module(feats)
    out = jax.block_until_ready(out)

    assert out.shape == (N, C, sum(s * s for s in SIZES)), out.shape

    ref = _reference_psp(np.asarray(feats))
    np.testing.assert_allclose(np.asarray(out), ref, rtol=1e-5, atol=1e-5)

    print("KERNEL_OK")
</pallas_src>

<mosaic_0001>
module attributes {stable_mosaic.version = 11 : i64} {
  func.func @_psp_matmul_kernel(%arg0: i32, %arg1: i32, %arg2: memref<8x256xf32, #tpu.memory_space<vmem>>, %arg3: memref<256x128xf32, #tpu.memory_space<vmem>>, %arg4: memref<1x128xf32, #tpu.memory_space<vmem>>, %arg5: memref<8x128xf32, #tpu.memory_space<vmem>>, %arg6: memref<8x128xf32, #tpu.memory_space<vmem>>) attributes {dimension_semantics = [#tpu.dimension_semantics<parallel>, #tpu.dimension_semantics<arbitrary>], iteration_bounds = array<i64: 1, 1>, scalar_prefetch = 0 : i64, scratch_operands = 1 : i64, tpu.core_type = #tpu.core_type<tc>, window_params = [{transform_indices = @transform_0, window_bounds = array<i64: 8, 256>}, {transform_indices = @transform_1, window_bounds = array<i64: 256, 128>}, {pipeline_mode = #tpu.pipeline_mode<synchronous>, transform_indices = @transform_2, window_bounds = array<i64: 1, 128>}, {transform_indices = @transform_3, window_bounds = array<i64: 8, 128>}]} {
    %c0_i32 = arith.constant 0 : i32
    %0 = arith.cmpi eq, %arg1, %c0_i32 : i32
    %1 = arith.extui %0 : i1 to i32
    %c0_i32_0 = arith.constant 0 : i32
    %2 = arith.cmpi ne, %1, %c0_i32_0 : i32
    scf.if %2 {
      %cst_10 = arith.constant 0.000000e+00 : f32
      %12 = vector.broadcast %cst_10 : f32 to vector<8x128xf32>
      %c0_11 = arith.constant 0 : index
      %c0_12 = arith.constant 0 : index
      %13 = vector.load %arg6[%c0_11, %c0_12] : memref<8x128xf32, #tpu.memory_space<vmem>>, vector<8x128xf32>
      tpu.vector_store %arg6[%c0_11, %c0_12], %12 {strides = array<i32>} : memref<8x128xf32, #tpu.memory_space<vmem>>, vector<8x128xf32>,
    } else {
    }
    %c0 = arith.constant 0 : index
    %c0_1 = arith.constant 0 : index
    %3 = vector.load %arg2[%c0, %c0_1] : memref<8x256xf32, #tpu.memory_space<vmem>>, vector<8x256xf32>
    %c0_2 = arith.constant 0 : index
    %c0_3 = arith.constant 0 : index
    %4 = vector.load %arg6[%c0_2, %c0_3] : memref<8x128xf32, #tpu.memory_space<vmem>>, vector<8x128xf32>
    %c0_4 = arith.constant 0 : index
    %c0_5 = arith.constant 0 : index
    %5 = vector.load %arg3[%c0_4, %c0_5] : memref<256x128xf32, #tpu.memory_space<vmem>>, vector<256x128xf32>
    %cst = arith.constant dense<0.000000e+00> : vector<8x128xf32>
    %6 = tpu.matmul %3, %5, %cst {dimension_numbers = #tpu.dot_dimension_numbers<[1], [0], [0], [1], [0, 0, 1, 1], [], []>, precision = #tpu.contract_precision<fp32>} : vector<8x256xf32>, vector<256x128xf32>, vector<8x128xf32> -> vector<8x128xf32>
    %7 = arith.addf %4, %6 : vector<8x128xf32>
    %c0_6 = arith.constant 0 : index
    %c0_7 = arith.constant 0 : index
    %8 = vector.load %arg6[%c0_6, %c0_7] : memref<8x128xf32, #tpu.memory_space<vmem>>, vector<8x128xf32>
    tpu.vector_store %arg6[%c0_6, %c0_7], %7 {strides = array<i32>} : memref<8x128xf32, #tpu.memory_space<vmem>>, vector<8x128xf32>,
    %c0_i32_8 = arith.constant 0 : i32
    %9 = arith.cmpi eq, %arg1, %c0_i32_8 : i32
    %10 = arith.extui %9 : i1 to i32
    %c0_i32_9 = arith.constant 0 : i32
    %11 = arith.cmpi ne, %10, %c0_i32_9 : i32
    scf.if %11 {
      %c0_10 = arith.constant 0 : index
      %c0_11 = arith.constant 0 : index
      %12 = vector.load %arg6[%c0_10, %c0_11] : memref<8x128xf32, #tpu.memory_space<vmem>>, vector<8x128xf32>
      %c0_12 = arith.constant 0 : index
      %c0_13 = arith.constant 0 : index
      %13 = vector.load %arg4[%c0_12, %c0_13] : memref<1x128xf32, #tpu.memory_space<vmem>>, vector<1x128xf32>
      %14 = vector.broadcast %13 : vector<1x128xf32> to vector<8x128xf32>
      %15 = arith.mulf %12, %14 : vector<8x128xf32>
      %c0_14 = arith.constant 0 : index
      %c0_15 = arith.constant 0 : index
      %16 = vector.load %arg5[%c0_14, %c0_15] : memref<8x128xf32, #tpu.memory_space<vmem>>, vector<8x128xf32>
      tpu.vector_store %arg5[%c0_14, %c0_15], %15 {strides = array<i32>} : memref<8x128xf32, #tpu.memory_space<vmem>>, vector<8x128xf32>,
    } else {
    }
    return
  }
  func.func @transform_0(%arg0: i32, %arg1: i32) -> (i32, i32) {
    %c0_i32 = arith.constant 0 : i32
    return %arg0, %arg1 : i32, i32
  }
  func.func @transform_1(%arg0: i32, %arg1: i32) -> (i32, i32) {
    %c0_i32 = arith.constant 0 : i32
    %c0_i32_0 = arith.constant 0 : i32
    return %arg1, %c0_i32 : i32, i32
  }
  func.func @transform_2(%arg0: i32, %arg1: i32) -> (i32, i32) {
    %c0_i32 = arith.constant 0 : i32
    %c0_i32_0 = arith.constant 0 : i32
    %c0_i32_1 = arith.constant 0 : i32
    return %c0_i32, %c0_i32_0 : i32, i32
  }
  func.func @transform_3(%arg0: i32, %arg1: i32) -> (i32, i32) {
    %c0_i32 = arith.constant 0 : i32
    %c0_i32_0 = arith.constant 0 : i32
    return %arg0, %c0_i32 : i32, i32
  }
}

</mosaic_0001>

<bundles_post_ra>
// kernel: tpu_custom_call.1
= control target key start
LH: loop header
LB: loop body
LE: loop exit
PB: predicated region body
PF: predicated region fallthrough
CT: control target
= control target key end

     0   :  { %8 = vsyncpa [#allocation4], 0  ;;  %s1923_s0 = inlined_call_operand.hbm [shape: f32[8,256], index: 0, kind: input, shape index: {}]   ;;  %s1924_s1 = inlined_call_operand.hbm [shape: f32[256,128], index: 1, kind: input, shape index: {}]   ;;  %s1925_s2 = inlined_call_operand.vmem [shape: f32[1,128], index: 2, kind: input, shape index: {}]   ;;  %s1926_s3 = inlined_call_operand.hbm [shape: f32[8,128], index: 3, kind: output, shape index: {}]  }
   0x1   :  { %9 = vsyncpa [#allocation7], 0 }
   0x2   :  { %10 = vsyncpa [#allocation5], 0  ;;  %s1454_s12 = smov [#allocation3]   ;;  %s1455_s14 = smov [#allocation6]  }
   0x3   :  { %s17_s13 = sshll.u32 %s1454_s12, 4  ;;  %s26_s15 = sshll.u32 %s1455_s14, 4  ;;  %s18_s13 = int_to_ptr.vmem [resolvable:$true] %s17_s13  ;;  %s1479_s15 = int_to_ptr.vmem [resolvable:$true] %s26_s15 }
   0x4   :  { %s1382_s18 = scalar_lea.hbm %s1923_s0, 256 }
   0x5   :  { %p1383_p0 = scmp.ne.s32.totalorder %s1923_s0, %s1382_s18  ;;  %p1386_p1 = scmp.lt.u32.totalorder %s1382_s18, %s1923_s0 }
   0x7   :  { %p1388_p2 = pnand %p1386_p1, %p1383_p0 }
   0x9   :  { %1391 = shalt.err (!%p1388_p2)
}
   0xa   :  { %s1392_s23 = scalar_lea.vmem %s18_s13, 256  ;;  %p1397_p4 = scmp.lt.s32.totalorder %s18_s13, %s18_s13 }
   0xb   :  { %p1393_p3 = scmp.ne.s32.totalorder %s18_s13, %s1392_s23  ;;  %p1398_p5 = scmp.lt.s32.totalorder %s1392_s23, %s1392_s23 }
   0xd   :  { %p1399_p6 = por %p1398_p5, %p1397_p4 }
   0xf   :  { %p1400_p7 = pnand %p1399_p6, %p1393_p3 }
  0x11   :  { %1403 = shalt.err (!%p1400_p7)
}
  0x12   :  { %20 = dma.hbm_to_vmem [thread:$0]  %s1923_s0, 256, %s18_s13, [#allocation4]  }
  0x13   :  { %s1404_s28 = scalar_lea.hbm %s1924_s1, 4096 }
  0x14   :  { %p1405_p8 = scmp.ne.s32.totalorder %s1924_s1, %s1404_s28  ;;  %p1408_p9 = scmp.lt.u32.totalorder %s1404_s28, %s1924_s1 }
  0x16   :  { %p1410_p10 = pnand %p1408_p9, %p1405_p8 }
  0x18   :  { %1413 = shalt.err (!%p1410_p10)
}
  0x19   :  { %s1414_s6 = scalar_lea.vmem %s1479_s15, 4096  ;;  %p1419_p12 = scmp.lt.s32.totalorder %s1479_s15, %s1479_s15 }
  0x1a   :  { %p1415_p11 = scmp.ne.s32.totalorder %s1479_s15, %s1414_s6  ;;  %p1420_p13 = scmp.lt.s32.totalorder %s1414_s6, %s1414_s6 }
  0x1c   :  { %p1421_p0 = por %p1420_p13, %p1419_p12 }
  0x1e   :  { %p1422_p1 = pnand %p1421_p0, %p1415_p11 }
  0x20   :  { %1425 = shalt.err (!%p1422_p1)
}
  0x21   :  { %s1456_s0 = smov 128   ;;  %s1457_s7 = smov 8  }
  0x22   :  { %32 = dma.hbm_to_vmem [thread:$0]  %s1924_s1, 4096, %s1479_s15, [#allocation7], %s1456_s0, %s1456_s0, %s1457_s7  }
  0x23   :  { %1448 = dma.done.wait [#allocation4], 256  }
  0x24   :  { %1449 = vsyncadd [#allocation4], 4294967040 }
  0x25   :  { %1450 = dma.done.wait [#allocation7], 4096  }
  0x26   :  { %1451 = vsyncadd [#allocation7], 4294963200  ;;  %v65_v0 = vld [vmem:[#allocation6 + $0x80] sm:$0xff]  ;;  %v66_v1 = vld [vmem:[#allocation6 + $0x88] sm:$0xff]  ;;  %s1458_s11 = smov [#allocation8]  }
  0x27   :  { %v49_v2 = vld [vmem:[#allocation6] sm:$0xff]  ;;  %v130_v3 = vand.u32 4294901760, %v65_v0  ;;  %v133_v4 = vand.u32 4294901760, %v66_v1  ;;  %v50_v5 = vld [vmem:[#allocation6 + $0x8] sm:$0xff]  ;;  %v67_v7 = vld [vmem:[#allocation6 + $0x90] sm:$0xff]  ;;  %s964_s12 = sshll.u32 %s1458_s11, 4  ;;  %s965_s12 = int_to_ptr.vmem [resolvable:$true] %s964_s12 }
  0x28   :  { %v82_v6 = vand.u32 4294901760, %v49_v2  ;;  %v68_v8 = vld [vmem:[#allocation6 + $0x98] sm:$0xff]  ;;  %v85_v9 = vand.u32 4294901760, %v50_v5  ;;  %v136_v10 = vand.u32 4294901760, %v67_v7  ;;  %v51_v12 = vld [vmem:[#allocation6 + $0x10] sm:$0xff]  ;;  %v69_v18 = vld [vmem:[#allocation6 + $0xa0] sm:$0xff]  ;;  %p1431_p3 = scmp.lt.s32.totalorder %s965_s12, %s965_s12 }
  0x29   :  { %v139_v11 = vand.u32 4294901760, %v68_v8  ;;  %v52_v13 = vld [vmem:[#allocation6 + $0x18] sm:$0xff]  ;;  %v1510_v14 = vpack.c.bf16 %v133_v4, %v130_v3  ;;  %v88_v16 = vand.u32 4294901760, %v51_v12  ;;  %v70_v19 = vld [vmem:[#allocation6 + $0xa8] sm:$0xff]  ;;  %v53_v23 = vld [vmem:[#allocation6 + $0x20] sm:$0xff]  ;;  %v142_v29 = vand.u32 4294901760, %v69_v18 }
  0x2a   :  { %v1512_v15 = vsub.f32 %v49_v2, %v82_v6  ;;  %v91_v17 = vand.u32 4294901760, %v52_v13  ;;  %v1514_v20 = vpack.c.bf16 %v85_v9, %v82_v6  ;;  %v1516_v21 = vsub.f32 %v50_v5, %v85_v9  ;;  %v54_v24 = vld [vmem:[#allocation6 + $0x28] sm:$0xff]  ;;  %v71_v37 = vld [vmem:[#allocation6 + $0xb0] sm:$0xff]  ;;  %v72_v42 = vld [vmem:[#allocation6 + $0xb8] sm:$0xff]  ;;  %s1426_s13 = scalar_lea.vmem %s965_s12, 128 }
  0x2b   :  { %v1518_v22 = vpack.c.bf16 %v139_v11, %v136_v10  ;;  %1186 = vmatprep.subr.bf16.mxu0 %v1510_v14  ;;  %v1521_v25 = vsub.f32 %v67_v7, %v136_v10  ;;  %v1523_v26 = vsub.f32 %v68_v8, %v139_v11  ;;  %v1527_v28 = vsub.f32 %v51_v12, %v88_v16  ;;  %v55_v55 = vld [vmem:[#allocation6 + $0x30] sm:$0xff]  ;;  %v56_v56 = vld [vmem:[#allocation6 + $0x38] sm:$0xff]  ;;  %v73_v5 = vld [vmem:[#allocation6 + $0xc0] sm:$0xff]  ;;  %p1427_p2 = scmp.ne.s32.totalorder %s965_s12, %s1426_s13  ;;  %p1432_p4 = scmp.lt.s32.totalorder %s1426_s13, %s1426_s13 }
  0x2c   :  { %v1525_v27 = vpack.c.bf16 %v91_v17, %v88_v16  ;;  %1188 = vmatpush3.bf16.msra.mxu0 %v1514_v20  ;;  %v145_v30 = vand.u32 4294901760, %v70_v19  ;;  %v1530_v31 = vsub.f32 %v65_v0, %v130_v3  ;;  %v1532_v32 = vsub.f32 %v66_v1, %v133_v4  ;;  %v74_v6 = vld [vmem:[#allocation6 + $0xc8] sm:$0xff]  ;;  %v57_v11 = vld [vmem:[#allocation6 + $0x40] sm:$0xff] }
  0x2d   :  { %1190 = vmatprep.subr.bf16.mxu0 %v1518_v22  ;;  %v94_v33 = vand.u32 4294901760, %v53_v23  ;;  %v97_v34 = vand.u32 4294901760, %v54_v24  ;;  %v1942_v35 = vand.u32 4294901760, %v1512_v15  ;;  %v1941_v36 = vand.u32 4294901760, %v1516_v21  ;;  %p1433_p5 = por %p1432_p4, %p1431_p3 }
  0x2e   :  { %v1537_v38 = vsub.f32 %v52_v13, %v91_v17  ;;  %v1539_v39 = vpack.c.bf16 %v145_v30, %v142_v29  ;;  %v1541_v40 = vsub.f32 %v69_v18, %v142_v29  ;;  %v1946_v41 = vand.u32 4294901760, %v1530_v31  ;;  %v58_v29 = vld [vmem:[#allocation6 + $0x48] sm:$0xff] }
  0x2f   :  { %v1544_v43 = vsub.f32 %v70_v19, %v145_v30  ;;  %v1944_v44 = vand.u32 4294901760, %v1532_v32  ;;  %v1547_v45 = vpack.c.bf16 %v97_v34, %v94_v33  ;;  %v1549_v46 = vsub.f32 %v53_v23, %v94_v33  ;;  %p1434_p6 = pnand %p1433_p5, %p1427_p2 }
  0x30   :  { %1192 = vmatpush3.bf16.msra.mxu0 %v1525_v27  ;;  %v309_v47 = vsub.f32 %v1530_v31, %v1946_v41  ;;  %v197_v48 = vsub.f32 %v1512_v15, %v1942_v35  ;;  %v204_v49 = vsub.f32 %v1516_v21, %v1941_v36  ;;  %v148_v50 = vand.u32 4294901760, %v71_v37  ;;  %v47_v41 = vld [vmem:[#allocation3 + $0x8] sm:$0xff] }
  0x31   :  { %1194 = vmatprep.subr.bf16.mxu0 %v1539_v39  ;;  %v316_v51 = vsub.f32 %v1532_v32, %v1944_v44  ;;  %v151_v52 = vand.u32 4294901760, %v72_v42  ;;  %v1939_v53 = vand.u32 4294901760, %v1521_v25  ;;  %v1937_v54 = vand.u32 4294901760, %v1523_v26 }
  0x32   :  { %v310_v57 = vand.u32 4294901760, %v309_v47  ;;  %v1567_v58 = vsub.f32 %v54_v24, %v97_v34  ;;  %v198_v59 = vand.u32 4294901760, %v197_v48  ;;  %v205_v60 = vand.u32 4294901760, %v204_v49 }
  0x33   :  { %v317_v61 = vand.u32 4294901760, %v316_v51  ;;  %v1569_v62 = vpack.c.bf16 %v151_v52, %v148_v50  ;;  %v1571_v63 = vsub.f32 %v71_v37, %v148_v50  ;;  %v323_v0 = vsub.f32 %v1521_v25, %v1939_v53 }
  0x34   :  { %1196 = vmatpush3.bf16.msra.mxu0 %v1547_v45  ;;  %v1219_v1 = vpack.c.bf16 %v205_v60, %v198_v59  ;;  %v330_v2 = vsub.f32 %v1523_v26, %v1937_v54  ;;  %v100_v3 = vand.u32 4294901760, %v55_v55  ;;  %v103_v4 = vand.u32 4294901760, %v56_v56  ;;  %v76_v59 = vld [vmem:[#allocation6 + $0xd8] sm:$0xff] }
  0x35   :  { %v1217_v7 = vpack.c.bf16 %v317_v61, %v310_v57  ;;  %1198 = vmatprep.subr.bf16.mxu0 %v1569_v62  ;;  %v324_v8 = vand.u32 4294901760, %v323_v0  ;;  %v1936_v9 = vand.u32 4294901760, %v1527_v28  ;;  %v1934_v10 = vand.u32 4294901760, %v1537_v38  ;;  %v75_v57 = vld [vmem:[#allocation6 + $0xd0] sm:$0xff]  ;;  %v80_v54 = vld [vmem:[#allocation6 + $0xf8] sm:$0xff] }
  0x36   :  { %v1583_v12 = vsub.f32 %v72_v42, %v151_v52  ;;  %v331_v13 = vand.u32 4294901760, %v330_v2  ;;  %v1585_v16 = vpack.c.bf16 %v103_v4, %v100_v3  ;;  %v1587_v17 = vsub.f32 %v55_v55, %v100_v3 }
  0x37   :  { %1218 = vmatprep.subr.bf16.mxu1 %v1217_v7  ;;  %v211_v18 = vsub.f32 %v1527_v28, %v1936_v9  ;;  %v218_v19 = vsub.f32 %v1537_v38, %v1934_v10  ;;  %v154_v23 = vand.u32 4294901760, %v73_v5  ;;  %v157_v24 = vand.u32 4294901760, %v74_v6  ;;  %v79_v9 = vld [vmem:[#allocation6 + $0xf0] sm:$0xff] }
  0x38   :  { %1220 = vmatpush3.bf16.msra.mxu1 %v1219_v1  ;;  %v1221_v30 = vpack.c.bf16 %v331_v13, %v324_v8  ;;  %1200 = vmatpush3.bf16.msra.mxu0 %v1585_v16  ;;  %v1932_v33 = vand.u32 4294901760, %v1541_v40  ;;  %v1931_v34 = vand.u32 4294901760, %v1544_v43  ;;  %v106_v37 = vand.u32 4294901760, %v57_v11  ;;  %v59_v1 = vld [vmem:[#allocation6 + $0x50] sm:$0xff] }
  0x39   :  { %v1598_v42 = vsub.f32 %v56_v56, %v103_v4  ;;  %v212_v47 = vand.u32 4294901760, %v211_v18  ;;  %v219_v48 = vand.u32 4294901760, %v218_v19  ;;  %v1600_v49 = vpack.c.bf16 %v157_v24, %v154_v23  ;;  %v60_v18 = vld [vmem:[#allocation6 + $0x58] sm:$0xff] }
  0x3a   :  { %1222 = vmatprep.subr.bf16.mxu1 %v1221_v30  ;;  %v1602_v50 = vsub.f32 %v73_v5, %v154_v23  ;;  %v337_v51 = vsub.f32 %v1541_v40, %v1932_v33  ;;  %v344_v52 = vsub.f32 %v1544_v43, %v1931_v34  ;;  %v109_v55 = vand.u32 4294901760, %v58_v29 }
  0x3b   :  { %v1223_v56 = vpack.c.bf16 %v219_v48, %v212_v47  ;;  %1202 = vmatprep.subr.bf16.mxu0 %v1600_v49  ;;  %v1611_v60 = vsub.f32 %v74_v6, %v157_v24  ;;  %v1929_v61 = vand.u32 4294901760, %v1549_v46  ;;  %v1927_v0 = vand.u32 4294901760, %v1567_v58 }
  0x3c   :  { %v338_v2 = vand.u32 4294901760, %v337_v51  ;;  %v345_v3 = vand.u32 4294901760, %v344_v52  ;;  %v1615_v4 = vpack.c.bf16 %v109_v55, %v106_v37  ;;  %v1617_v5 = vsub.f32 %v57_v11, %v106_v37 }
  0x3d   :  { %1224 = vmatpush3.bf16.msra.mxu1 %v1223_v56  ;;  %v225_v7 = vsub.f32 %v1549_v46, %v1929_v61  ;;  %v232_v6 = vsub.f32 %v1567_v58, %v1927_v0  ;;  %v160_v8 = vand.u32 4294901760, %v75_v57  ;;  %v163_v13 = vand.u32 4294901760, %v76_v59  ;;  %v78_v0 = vld [vmem:[#allocation6 + $0xe8] sm:$0xff] }
  0x3e   :  { %v1225_v19 = vpack.c.bf16 %v345_v3, %v338_v2  ;;  %1204 = vmatpush3.bf16.msra.mxu0 %v1615_v4  ;;  %v1928_v23 = vand.u32 4294901760, %v1571_v63  ;;  %v1930_v11 = vand.u32 4294901760, %v1583_v12  ;;  %v112_v24 = vand.u32 4294901760, %v59_v1  ;;  %v77_v3 = vld [vmem:[#allocation6 + $0xe0] sm:$0xff] }
  0x3f   :  { %v1628_v30 = vsub.f32 %v58_v29, %v109_v55  ;;  %v226_v37 = vand.u32 4294901760, %v225_v7  ;;  %v233_v47 = vand.u32 4294901760, %v232_v6  ;;  %v1630_v48 = vpack.c.bf16 %v163_v13, %v160_v8  ;;  %v61_v6 = vld [vmem:[#allocation6 + $0x60] sm:$0xff] }
  0x40   :  { %1226 = vmatprep.subr.bf16.mxu1 %v1225_v19  ;;  %v1632_v51 = vsub.f32 %v75_v57, %v160_v8  ;;  %v351_v52 = vsub.f32 %v1571_v63, %v1928_v23  ;;  %v358_v56 = vsub.f32 %v1583_v12, %v1930_v11  ;;  %v115_v2 = vand.u32 4294901760, %v60_v18  ;;  %v62_v11 = vld [vmem:[#allocation6 + $0x68] sm:$0xff] }
  0x41   :  { %v1227_v29 = vpack.c.bf16 %v233_v47, %v226_v37  ;;  %1206 = vmatprep.subr.bf16.mxu0 %v1630_v48  ;;  %v1641_v55 = vsub.f32 %v76_v59, %v163_v13  ;;  %v1933_v7 = vand.u32 4294901760, %v1587_v17  ;;  %v1935_v57 = vand.u32 4294901760, %v1598_v42 }
  0x42   :  { %v352_v8 = vand.u32 4294901760, %v351_v52  ;;  %v359_v19 = vand.u32 4294901760, %v358_v56  ;;  %v1645_v23 = vpack.c.bf16 %v115_v2, %v112_v24  ;;  %v1647_v61 = vsub.f32 %v59_v1, %v112_v24 }
  0x43   :  { %1228 = vmatpush3.bf16.msra.mxu1 %v1227_v29  ;;  %v239_v37 = vsub.f32 %v1587_v17, %v1933_v7  ;;  %v246_v59 = vsub.f32 %v1598_v42, %v1935_v57  ;;  %v166_v13 = vand.u32 4294901760, %v77_v3  ;;  %v169_v47 = vand.u32 4294901760, %v78_v0 }
  0x44   :  { %1972 = vst [vmem:[#allocation12_spill] sm:$0xff] %v1645_v23  ;;  %v1229_v34 = vpack.c.bf16 %v359_v19, %v352_v8  ;;  %1208 = vmatpush3.bf16.msra.mxu0 %v1645_v23  ;;  %v1938_v52 = vand.u32 4294901760, %v1602_v50  ;;  %v1940_v1 = vand.u32 4294901760, %v1611_v60  ;;  %v118_v24 = vand.u32 4294901760, %v61_v6 }
  0x45   :  { %v1658_v56 = vsub.f32 %v60_v18, %v115_v2  ;;  %v240_v29 = vand.u32 4294901760, %v239_v37  ;;  %v247_v33 = vand.u32 4294901760, %v246_v59  ;;  %v1660_v7 = vpack.c.bf16 %v169_v47, %v166_v13  ;;  %v63_v37 = vld [vmem:[#allocation6 + $0x70] sm:$0xff] }
  0x46   :  { %1230 = vmatprep.subr.bf16.mxu1 %v1229_v34  ;;  %v1662_v10 = vsub.f32 %v77_v3, %v166_v13  ;;  %v365_v8 = vsub.f32 %v1602_v50, %v1938_v52  ;;  %v372_v19 = vsub.f32 %v1611_v60, %v1940_v1  ;;  %v121_v57 = vand.u32 4294901760, %v62_v11  ;;  %v64_v1 = vld [vmem:[#allocation6 + $0x78] sm:$0xff] }
  0x47   :  { %1973 = vst [vmem:[#allocation13_spill] sm:$0xff] %v1660_v7  ;;  %v1231_v18 = vpack.c.bf16 %v247_v33, %v240_v29  ;;  %1210 = vmatprep.subr.bf16.mxu0 %v1660_v7  ;;  %v1671_v2 = vsub.f32 %v78_v0, %v169_v47  ;;  %v1943_v34 = vand.u32 4294901760, %v1617_v5  ;;  %v1945_v3 = vand.u32 4294901760, %v1628_v30 }
  0x48   :  { %v366_v59 = vand.u32 4294901760, %v365_v8  ;;  %v373_v13 = vand.u32 4294901760, %v372_v19  ;;  %v1675_v52 = vpack.c.bf16 %v121_v57, %v118_v24  ;;  %v1677_v53 = vsub.f32 %v61_v6, %v118_v24 }
  0x49   :  { %1232 = vmatpush3.bf16.msra.mxu1 %v1231_v18  ;;  %v253_v33 = vsub.f32 %v1617_v5, %v1943_v34  ;;  %v260_v0 = vsub.f32 %v1628_v30, %v1945_v3  ;;  %v172_v47 = vand.u32 4294901760, %v79_v9  ;;  %v175_v29 = vand.u32 4294901760, %v80_v54 }
  0x4a   :  { %1974 = vst [vmem:[#allocation14_spill] sm:$0xff] %v1675_v52  ;;  %v1233_v36 = vpack.c.bf16 %v373_v13, %v366_v59  ;;  %1212 = vmatpush3.bf16.msra.mxu0 %v1675_v52  ;;  %v1949_v8 = vand.u32 4294901760, %v1632_v51  ;;  %v1950_v6 = vand.u32 4294901760, %v1641_v55  ;;  %v124_v24 = vand.u32 4294901760, %v63_v37 }
  0x4b   :  { %v1688_v19 = vsub.f32 %v62_v11, %v121_v57  ;;  %v254_v18 = vand.u32 4294901760, %v253_v33  ;;  %v261_v35 = vand.u32 4294901760, %v260_v0  ;;  %v1690_v34 = vpack.c.bf16 %v175_v29, %v172_v47 }
  0x4c   :  { %1234 = vmatprep.subr.bf16.mxu1 %v1233_v36  ;;  %v1692_v44 = vsub.f32 %v79_v9, %v172_v47  ;;  %v379_v59 = vsub.f32 %v1632_v51, %v1949_v8  ;;  %v386_v13 = vsub.f32 %v1641_v55, %v1950_v6  ;;  %v127_v3 = vand.u32 4294901760, %v64_v1  ;;  %v46_v9 = vld [vmem:[#allocation3] sm:$0xff] }
  0x4d   :  { %1975 = vst [vmem:[#allocation15_spill] sm:$0xff] %v1690_v34  ;;  %v1235_v52 = vpack.c.bf16 %v261_v35, %v254_v18  ;;  %1214 = vmatprep.subr.bf16.mxu0 %v1690_v34  ;;  %v1701_v11 = vsub.f32 %v80_v54, %v175_v29  ;;  %v1951_v57 = vand.u32 4294901760, %v1647_v61  ;;  %v1952_v36 = vand.u32 4294901760, %v1658_v56 }
  0x4e   :  { %v380_v33 = vand.u32 4294901760, %v379_v59  ;;  %v387_v0 = vand.u32 4294901760, %v386_v13  ;;  %v1705_v47 = vpack.c.bf16 %v127_v3, %v124_v24  ;;  %v1707_v8 = vsub.f32 %v63_v37, %v124_v24 }
  0x4f   :  { %1236 = vmatpush3.bf16.msra.mxu1 %v1235_v52  ;;  %v267_v35 = vsub.f32 %v1647_v61, %v1951_v57  ;;  %v274_v54 = vsub.f32 %v1658_v56, %v1952_v36  ;;  %v1715_v29 = vand.u32 4294901760, %v47_v41  ;;  %v1955_v18 = vand.u32 4294901760, %v1662_v10 }
  0x50   :  { %1976 = vst [vmem:[#allocation16_spill] sm:$0xff] %v1705_v47  ;;  %v1237_v6 = vpack.c.bf16 %v387_v0, %v380_v33  ;;  %1216 = vmatpush3.bf16.msra.mxu0 %v1705_v47  ;;  %v1961_v59 = vand.u32 4294901760, %v1671_v2  ;;  %v1249_v52 = vpack.c.bf16 %v1532_v32, %v1530_v31  ;;  %v1722_v37 = vand.u32 4294901760, %v46_v9 }
  0x51   :  { %1977 = vst [vmem:[#allocation17_spill] sm:$0xff] %v1715_v29  ;;  %v268_v24 = vand.u32 4294901760, %v267_v35  ;;  %v275_v13 = vand.u32 4294901760, %v274_v54  ;;  %v1725_v57 = vsub.f32 %v47_v41, %v1715_v29  ;;  %v393_v36 = vsub.f32 %v1662_v10, %v1955_v18  ;;  %418 = vmatprep.mubr.f32.mxu1 %v1715_v29 }
  0x52   :  { %1238 = vmatprep.subr.bf16.mxu1 %v1237_v6  ;;  %v400_v33 = vsub.f32 %v1671_v2, %v1961_v59  ;;  %1250 = vmatprep.subr.bf16.mxu0 %v1249_v52  ;;  %v1735_v0 = vsub.f32 %v46_v9, %v1722_v37  ;;  %v1960_v35 = vand.u32 4294901760, %v1677_v53  ;;  %v1962_v41 = vand.u32 4294901760, %v1688_v19 }
  0x53   :  { %v1739_v54 = vsub.f32 %v64_v1, %v127_v3  ;;  %v1239_v47 = vpack.c.bf16 %v275_v13, %v268_v24  ;;  %v1963_v18 = vand.u32 4294901760, %v1725_v57  ;;  %v394_v34 = vand.u32 4294901760, %v393_v36 }
  0x54   :  { %v401_v29 = vand.u32 4294901760, %v400_v33  ;;  %v185_v6 = vand.u32 4294901760, %v1735_v0  ;;  %v281_v52 = vsub.f32 %v1677_v53, %v1960_v35  ;;  %v288_v9 = vsub.f32 %v1688_v19, %v1962_v41 }
  0x55   :  { %1240 = vmatpush3.bf16.msra.mxu1 %v1239_v47  ;;  %v180_v1 = vsub.f32 %v1725_v57, %v1963_v18  ;;  %v1251_v3 = vpack.c.bf16 %v1516_v21, %v1512_v15  ;;  %v1968_v36 = vand.u32 4294901760, %v1692_v44  ;;  %v1971_v24 = vand.u32 4294901760, %v1701_v11 }
  0x56   :  { %v1241_v13 = vpack.c.bf16 %v401_v29, %v394_v34  ;;  %v186_v33 = vsub.f32 %v1735_v0, %v185_v6  ;;  %v282_v35 = vand.u32 4294901760, %v281_v52  ;;  %v289_v59 = vand.u32 4294901760, %v288_v9 }
  0x57   :  { %v181_v41 = vand.u32 4294901760, %v180_v1  ;;  %v407_v47 = vsub.f32 %v1692_v44, %v1968_v36  ;;  %v414_v18 = vsub.f32 %v1701_v11, %v1971_v24  ;;  %v1970_v7 = vand.u32 4294901760, %v1707_v8 }
  0x58   :  { %1242 = vmatprep.subr.bf16.mxu1 %v1241_v13  ;;  %v187_v23 = vand.u32 4294901760, %v186_v33  ;;  %v1243_v34 = vpack.c.bf16 %v289_v59, %v282_v35  ;;  %v1253_v29 = vpack.c.bf16 %v1523_v26, %v1521_v25  ;;  %v1969_v52 = vand.u32 4294901760, %v1739_v54 }
  0x59   :  { %182 = vmatprep.mubr.f32.mxu0 %v181_v41  ;;  %v408_v9 = vand.u32 4294901760, %v407_v47  ;;  %v415_v1 = vand.u32 4294901760, %v414_v18  ;;  %v295_v36 = vsub.f32 %v1707_v8, %v1970_v7  ;;  %v1255_v33 = vpack.c.bf16 %v1537_v38, %v1527_v28 }
  0x5a   :  { %188 = vmatmul.mubr.f32.vlgmr.msra.gmra.mrb[0].mxu0 %v187_v23  ;;  %1244 = vmatpush3.bf16.msra.mxu1 %v1243_v34  ;;  %v302_v13 = vsub.f32 %v1739_v54, %v1969_v52  ;;  %v1257_v41 = vpack.c.bf16 %v1544_v43, %v1541_v40  ;;  %v1259_v23 = vpack.c.bf16 %v1567_v58, %v1549_v46  ;;  %v1979_v34 = vand.u32 4294901760, %v1532_v32 }
  0x5b   :  { %1252 = vmatpush3.bf16.msra.mxu0 %v1251_v3  ;;  %v1245_v59 = vpack.c.bf16 %v415_v1, %v408_v9  ;;  %v296_v35 = vand.u32 4294901760, %v295_v36  ;;  %555 = vmatprep.mubr.f32.mxu0 %v1725_v57  ;;  %v1261_v47 = vpack.c.bf16 %v1583_v12, %v1571_v63  ;;  %v1978_v36 = vand.u32 4294901760, %v1530_v31 }
  0x5c   :  { %1254 = vmatprep.subr.bf16.mxu0 %v1253_v29  ;;  %v303_v18 = vand.u32 4294901760, %v302_v13  ;;  %v1980_v1 = vand.u32 4294901760, %v1512_v15  ;;  %v1981_v29 = vand.u32 4294901760, %v1516_v21  ;;  %v1982_v52 = vand.u32 4294901760, %v1521_v25 }
  0x5d   :  { %1246 = vmatprep.subr.bf16.mxu1 %v1245_v59  ;;  %v1313_v9 = vpack.c.bf16 %v1979_v34, %v1978_v36  ;;  %v1983_v59 = vand.u32 4294901760, %v1523_v26  ;;  %v1984_v24 = vand.u32 4294901760, %v1527_v28  ;;  %v1986_v31 = vand.u32 4294901760, %v1541_v40 }
  0x5e   :  { %v1247_v3 = vpack.c.bf16 %v303_v18, %v296_v35  ;;  %v1315_v13 = vpack.c.bf16 %v1981_v29, %v1980_v1  ;;  %v1985_v35 = vand.u32 4294901760, %v1537_v38  ;;  %v1987_v32 = vand.u32 4294901760, %v1544_v43  ;;  %v2002_v29 = vld [vmem:[#allocation14_spill] sm:$0xff] }
  0x5f   :  { %v1317_v7 = vpack.c.bf16 %v1983_v59, %v1982_v52  ;;  %1256 = vmatpush3.bf16.msra.mxu0 %v1255_v33  ;;  %v1988_v15 = vand.u32 4294901760, %v1549_v46  ;;  %v1989_v21 = vand.u32 4294901760, %v1567_v58  ;;  %v1990_v25 = vand.u32 4294901760, %v1571_v63  ;;  %v2003_v59 = vld [vmem:[#allocation15_spill] sm:$0xff] }
  0x60   :  { %v1319_v18 = vpack.c.bf16 %v1985_v35, %v1984_v24  ;;  %v1321_v36 = vpack.c.bf16 %v1987_v32, %v1986_v31  ;;  %v1991_v26 = vand.u32 4294901760, %v1583_v12  ;;  %1248 = vmatpush3.bf16.msra.mxu1 %v1247_v3  ;;  %1258 = vmatprep.subr.bf16.mxu0 %v1257_v41  ;;  %v1992_v28 = vand.u32 4294901760, %v1587_v17  ;;  %v2004_v35 = vld [vmem:[#allocation16_spill] sm:$0xff] }
  0x61   :  { %v1323_v34 = vpack.c.bf16 %v1989_v21, %v1988_v15  ;;  %v1993_v38 = vand.u32 4294901760, %v1598_v42  ;;  %v1994_v43 = vand.u32 4294901760, %v1602_v50  ;;  %v1995_v24 = vand.u32 4294901760, %v1611_v60  ;;  %1282 = vmatprep.subr.bf16.mxu1 %v1510_v14 }
  0x62   :  { %v1325_v52 = vpack.c.bf16 %v1991_v26, %v1990_v25  ;;  %v1996_v58 = vand.u32 4294901760, %v1617_v5  ;;  %v1997_v33 = vand.u32 4294901760, %v1628_v30  ;;  %v1263_v12 = vpack.c.bf16 %v1598_v42, %v1587_v17 }
  0x63   :  { %v1327_v40 = vpack.c.bf16 %v1993_v38, %v1992_v28  ;;  %v1329_v46 = vpack.c.bf16 %v1995_v24, %v1994_v43  ;;  %420 = vmatmul.mubr.f32.vlgmr.msra.gmra.mrb[0].mxu1 %v1722_v37  ;;  %1260 = vmatpush3.bf16.msra.mxu0 %v1259_v23  ;;  %v1265_v41 = vpack.c.bf16 %v1611_v60, %v1602_v50  ;;  %v1998_v3 = vand.u32 4294901760, %v1725_v57  ;;  %v1999_v57 = vld [vmem:[#allocation12_spill] sm:$0xff]  ;;  %v2000_v23 = vld [vmem:[#allocation13_spill] sm:$0xff] }
  0x64   :  { %v1331_v63 = vpack.c.bf16 %v1997_v33, %v1996_v58  ;;  %1284 = vmatpush3.bf16.msra.mxu1 %v1514_v20  ;;  %1262 = vmatprep.subr.bf16.mxu0 %v1261_v47  ;;  %v1267_v1 = vpack.c.bf16 %v1628_v30, %v1617_v5  ;;  %v1269_v17 = vpack.c.bf16 %v1641_v55, %v1632_v51  ;;  %v2001_v47 = vld [vmem:[#allocation17_spill] sm:$0xff] }
  0x65   :  { %1286 = vmatprep.subr.bf16.mxu1 %v1518_v22  ;;  %662 = vmatprep.mubr.f32.mxu1 %v1998_v3  ;;  %v1271_v42 = vpack.c.bf16 %v1658_v56, %v1647_v61  ;;  %v1273_v50 = vpack.c.bf16 %v1671_v2, %v1662_v10  ;;  %v1275_v60 = vpack.c.bf16 %v1688_v19, %v1677_v53  ;;  %v974_v38 = vld [vmem:[%s1925_s2] ss:$0 sm:$0xff] }
  0x66   :  { %v1277_v5 = vpack.c.bf16 %v1701_v11, %v1692_v44  ;;  %v1279_v30 = vpack.c.bf16 %v1739_v54, %v1707_v8 }
  0x67   :  { %1264 = vmatpush3.bf16.msra.mxu0 %v1263_v12 }
  0x68   :  { %1288 = vmatpush3.bf16.msra.mxu1 %v1525_v27  ;;  %1266 = vmatprep.subr.bf16.mxu0 %v1265_v41 }
  0x69   :  { %1290 = vmatprep.subr.bf16.mxu1 %v1539_v39 }
  0x6b   :  { %1268 = vmatpush3.bf16.msra.mxu0 %v1267_v1 }
  0x6c   :  { %1292 = vmatpush3.bf16.msra.mxu1 %v1547_v45  ;;  %1270 = vmatprep.subr.bf16.mxu0 %v1269_v17 }
  0x6d   :  { %1294 = vmatprep.subr.bf16.mxu1 %v1569_v62 }
  0x6f   :  { %1272 = vmatpush3.bf16.msra.mxu0 %v1271_v42 }
  0x70   :  { %1296 = vmatpush3.bf16.msra.mxu1 %v1585_v16  ;;  %1274 = vmatprep.subr.bf16.mxu0 %v1273_v50 }
  0x71   :  { %1298 = vmatprep.subr.bf16.mxu1 %v1600_v49 }
  0x73   :  { %1276 = vmatpush3.bf16.msra.mxu0 %v1275_v60 }
  0x74   :  { %1300 = vmatpush3.bf16.msra.mxu1 %v1615_v4  ;;  %1278 = vmatprep.subr.bf16.mxu0 %v1277_v5 }
  0x75   :  { %1302 = vmatprep.subr.bf16.mxu1 %v1630_v48 }
  0x77   :  { %1280 = vmatpush3.bf16.msra.mxu0 %v1279_v30 }
  0x78   :  { %1304 = vmatpush3.bf16.msra.mxu1 %v1999_v57  ;;  %1314 = vmatprep.subr.bf16.mxu0 %v1313_v9  ;;  %v2006_v9 = vand.u32 4294901760, %v1641_v55 }
  0x79   :  { %1306 = vmatprep.subr.bf16.mxu1 %v2000_v23 }
  0x7a   :  { %558 = vmatmul.mubr.f32.vlgmr.msra.gmra.mrb[2].mxu0 %v1735_v0  ;;  %v2007_v0 = vand.u32 4294901760, %v1647_v61  ;;  %v2013_v61 = vand.u32 4294901760, %v1692_v44 }
  0x7b   :  { %1316 = vmatpush3.bf16.msra.mxu0 %v1315_v13  ;;  %832 = vmatprep.mubr.f32.mxu0 %v2001_v47 }
  0x7c   :  { %1308 = vmatpush3.bf16.msra.mxu1 %v2002_v29  ;;  %1318 = vmatprep.subr.bf16.mxu0 %v1317_v7  ;;  %v2005_v7 = vand.u32 4294901760, %v1632_v51  ;;  %v2011_v51 = vand.u32 4294901760, %v1677_v53 }
  0x7d   :  { %1310 = vmatprep.subr.bf16.mxu1 %v2003_v59 }
  0x7f   :  { %1320 = vmatpush3.bf16.msra.mxu0 %v1319_v18 }
  0x80   :  { %1312 = vmatpush3.bf16.msra.mxu1 %v2004_v35  ;;  %1322 = vmatprep.subr.bf16.mxu0 %v1321_v36 }
  0x81   :  { %1346 = vmatprep.subr.bf16.mxu1 %v1510_v14  ;;  %v1333_v14 = vpack.c.bf16 %v2006_v9, %v2005_v7 }
  0x83   :  { %666 = vmatmul.mubr.f32.vlgmr.msra.gmra.mrb[2].mxu1 %v185_v6  ;;  %1324 = vmatpush3.bf16.msra.mxu0 %v1323_v34 }
  0x84   :  { %1348 = vmatpush3.bf16.msra.mxu1 %v1514_v20  ;;  %1326 = vmatprep.subr.bf16.mxu0 %v1325_v52  ;;  %v2008_v20 = vand.u32 4294901760, %v1658_v56 }
  0x85   :  { %1350 = vmatprep.subr.bf16.mxu1 %v1518_v22  ;;  %936 = vmatprep.mubr.f32.mxu1 %v2001_v47  ;;  %v2009_v22 = vand.u32 4294901760, %v1662_v10  ;;  %v2015_v10 = vand.u32 4294901760, %v1707_v8 }
  0x86   :  { %v1335_v6 = vpack.c.bf16 %v2008_v20, %v2007_v0 }
  0x87   :  { %1328 = vmatpush3.bf16.msra.mxu0 %v1327_v40 }
  0x88   :  { %1352 = vmatpush3.bf16.msra.mxu1 %v1525_v27  ;;  %1330 = vmatprep.subr.bf16.mxu0 %v1329_v46  ;;  %v2010_v27 = vand.u32 4294901760, %v1671_v2 }
  0x89   :  { %1354 = vmatprep.subr.bf16.mxu1 %v1539_v39  ;;  %v2012_v39 = vand.u32 4294901760, %v1688_v19 }
  0x8a   :  { %v1337_v13 = vpack.c.bf16 %v2010_v27, %v2009_v22 }
  0x8b   :  { %1332 = vmatpush3.bf16.msra.mxu0 %v1331_v63  ;;  %v1339_v55 = vpack.c.bf16 %v2012_v39, %v2011_v51 }
  0x8c   :  { %1356 = vmatpush3.bf16.msra.mxu1 %v1547_v45  ;;  %1334 = vmatprep.subr.bf16.mxu0 %v1333_v14  ;;  %v2014_v45 = vand.u32 4294901760, %v1701_v11 }
  0x8d   :  { %1358 = vmatprep.subr.bf16.mxu1 %v1569_v62  ;;  %v2016_v62 = vand.u32 4294901760, %v1739_v54 }
  0x8e   :  { %v1341_v56 = vpack.c.bf16 %v2014_v45, %v2013_v61 }
  0x8f   :  { %1336 = vmatpush3.bf16.msra.mxu0 %v1335_v6  ;;  %v1343_v2 = vpack.c.bf16 %v2016_v62, %v2015_v10 }
  0x90   :  { %1360 = vmatpush3.bf16.msra.mxu1 %v1585_v16  ;;  %1338 = vmatprep.subr.bf16.mxu0 %v1337_v13 }
  0x91   :  { %1362 = vmatprep.subr.bf16.mxu1 %v1600_v49 }
  0x93   :  { %1340 = vmatpush3.bf16.msra.mxu0 %v1339_v55 }
  0x94   :  { %1364 = vmatpush3.bf16.msra.mxu1 %v1615_v4  ;;  %1342 = vmatprep.subr.bf16.mxu0 %v1341_v56 }
  0x95   :  { %1366 = vmatprep.subr.bf16.mxu1 %v1630_v48 }
  0x97   :  { %1344 = vmatpush3.bf16.msra.mxu0 %v1343_v2 }
  0x98   :  { %1368 = vmatpush3.bf16.msra.mxu1 %v1999_v57 }
  0x99   :  { %1370 = vmatprep.subr.bf16.mxu1 %v2000_v23 }
  0x9a   :  { %834 = vmatmul.mubr.f32.vlgmr.msra.gmra.mrb[4].mxu0 %v1722_v37 }
  0x9c   :  { %1372 = vmatpush3.bf16.msra.mxu1 %v2002_v29 }
  0x9d   :  { %1374 = vmatprep.subr.bf16.mxu1 %v2003_v59 }
  0xa0   :  { %1376 = vmatpush3.bf16.msra.mxu1 %v2004_v35 }
  0xa3   :  { %938 = vmatmul.mubr.f32.vlgmr.msra.gmra.mrb[4].mxu1 %v1722_v37 }
 0x12d   :  { %v1007_v44 = vpop.f32.mrb[0].mxu0 }
 0x12e   :  { %v1008_v53 = vpop.f32.mrb[1].mxu0 }
 0x12f   :  { %v1009_v16 = vadd.f32 %v1008_v53, %v1007_v44 }
 0x136   :  { %v1042_v49 = vpop.f32.mrb[0].mxu1 }
 0x137   :  { %v1043_v4 = vpop.f32.mrb[1].mxu1 }
 0x138   :  { %v1044_v48 = vadd.f32 %v1043_v4, %v1042_v49 }
 0x13a   :  { %v422_v8 = vadd.f32 %v1044_v48, %v1009_v16 }
 0x14d   :  { %v1077_v19 = vpop.f32.mrb[2].mxu0 }
 0x14e   :  { %v1078_v11 = vpop.f32.mrb[3].mxu0 }
 0x14f   :  { %v1079_v54 = vadd.f32 %v1078_v11, %v1077_v19 }
 0x151   :  { %v560_v18 = vadd.f32 %v1079_v54, %v422_v8 }
 0x156   :  { %v1112_v31 = vpop.f32.mrb[2].mxu1 }
 0x157   :  { %v1113_v32 = vpop.f32.mrb[3].mxu1 }
 0x158   :  { %v1114_v36 = vadd.f32 %v1113_v32, %v1112_v31 }
 0x15a   :  { %v668_v15 = vadd.f32 %v1114_v36, %v560_v18 }
 0x16d   :  { %v1147_v21 = vpop.f32.mrb[4].mxu0 }
 0x16e   :  { %v1148_v34 = vpop.f32.mrb[5].mxu0 }
 0x16f   :  { %v1149_v25 = vadd.f32 %v1148_v34, %v1147_v21 }
 0x171   :  { %v836_v26 = vadd.f32 %v1149_v25, %v668_v15 }
 0x176   :  { %v1182_v37 = vpop.f32.mrb[4].mxu1 }
 0x177   :  { %v1183_v52 = vpop.f32.mrb[5].mxu1 }
 0x178   :  { %v1184_v28 = vadd.f32 %v1183_v52, %v1182_v37 }
 0x17a   :  { %v940_v40 = vadd.f32 %v1184_v28, %v836_v26 }
 0x17c   :  { %v956_v43 = vmul.f32 %v974_v38, %v940_v40 }
 0x17e   :  { %957 = vst [vmem:[#allocation8] sm:$0xff] %v956_v43 }
 0x17f   :  { %1437 = shalt.err (!%p1434_p6)
}
 0x180   :  { %s1438_s16 = scalar_lea.hbm %s1926_s3, 128 }
 0x181   :  { %p1439_p7 = scmp.ne.s32.totalorder %s1926_s3, %s1438_s16  ;;  %p1442_p8 = scmp.lt.u32.totalorder %s1438_s16, %s1926_s3 }
 0x183   :  { %p1444_p9 = pnand %p1442_p8, %p1439_p7 }
 0x185   :  { %1447 = shalt.err (!%p1444_p9)
}
 0x186   :  { %967 = dma.vmem_to_hbm [thread:$0]  %s965_s12, 128, %s1926_s3, [#allocation5]  }
 0x187   :  { %1452 = dma.done.wait [#allocation5], 128  }
 0x188   :  { %1453 = vsyncadd [#allocation5], 4294967168 }
 0x189   :  { %971 = vsyncpa [#allocation4], 1 }
 0x18a   :  { %972 = vsyncpa [#allocation7], 1 }
 0x18b   :  { %973 = vsyncpa [#allocation5], 1 }

</bundles_post_ra>
